<compile_context>
chip_gen: v6e
topology: v6e:2x2x1
jax: 0.10.0
libtpu: 0.0.40
codegen_flags: <defaults>
</compile_context>

<pallas_src>
import functools

import jax
import jax.numpy as jnp
from jax.experimental import pallas as pl
from jax.experimental.pallas import tpu as pltpu


def _round_up(n, m):
    return ((n + m - 1) // m) * m


def _pad_to(a, shape):
    pads = [(0, t - s) for s, t in zip(a.shape, shape)]
    if all(p == (0, 0) for p in pads):
        return a
    return jnp.pad(a, pads)


def mlp_kernel(x_ref, w1_ref, b1_ref, w2_ref, b2_ref, w3_ref, b3_ref, o_ref):
    # fc1 + ReLU  (bf16 operands -> f32 accumulate; bias/ReLU in f32)
    h1 = jnp.dot(x_ref[...], w1_ref[...], preferred_element_type=jnp.float32)
    h1 = jnp.maximum(h1 + b1_ref[...], 0.0).astype(jnp.bfloat16)
    # fc2 + ReLU
    h2 = jnp.dot(h1, w2_ref[...], preferred_element_type=jnp.float32)
    h2 = jnp.maximum(h2 + b2_ref[...], 0.0).astype(jnp.bfloat16)
    # fc3 (no activation)
    out = jnp.dot(h2, w3_ref[...], preferred_element_type=jnp.float32) + b3_ref[...]
    o_ref[...] = out.astype(o_ref.dtype)


@functools.partial(jax.jit, static_argnames=("tile_b",))
def mlp_forward(x, params, *, tile_b=256):
    """Fused 3-layer MLP forward pass, tiled over the batch dimension.

    Feature dims are zero-padded to multiples of 128 (lane-dense MXU / stores),
    the batch is padded to a multiple of the batch tile, and padding is sliced
    off before returning.  Zero-padding is semantics-preserving: padded input
    columns hit zero weight rows, and padded hidden/output units have zero
    weights and zero bias (ReLU(0) = 0 contributes nothing downstream).
    """
    (w1, b1), (w2, b2), (w3, b3) = params
    B, in_dim = x.shape
    h1_dim = w1.shape[1]
    h2_dim = w2.shape[1]
    out_dim = w3.shape[1]

    # --- padded (lane-dense) dimensions -----------------------------------
    in_p = _round_up(in_dim, 128)
    h1_p = _round_up(h1_dim, 128)
    h2_p = _round_up(h2_dim, 128)
    out_p = _round_up(out_dim, 128)

    # Batch tile: biggest requested tile that the (padded) batch supports,
    # always a multiple of 8 (sublane constraint).
    tb = min(tile_b, _round_up(B, 8))
    B_p = _round_up(B, tb)
    grid = (B_p // tb,)

    # --- pad + cast operands ----------------------------------------------
    xp = _pad_to(x, (B_p, in_p)).astype(jnp.bfloat16)
    w1p = _pad_to(w1, (in_p, h1_p)).astype(jnp.bfloat16)
    w2p = _pad_to(w2, (h1_p, h2_p)).astype(jnp.bfloat16)
    w3p = _pad_to(w3, (h2_p, out_p)).astype(jnp.bfloat16)
    b1p = _pad_to(b1.reshape(1, -1), (1, h1_p)).astype(jnp.float32)
    b2p = _pad_to(b2.reshape(1, -1), (1, h2_p)).astype(jnp.float32)
    b3p = _pad_to(b3.reshape(1, -1), (1, out_p)).astype(jnp.float32)

    out_dtype = jnp.float32

    # Advisory cost estimate for XLA's scheduler.
    flops = 2 * B_p * (in_p * h1_p + h1_p * h2_p + h2_p * out_p)
    bytes_accessed = (
        xp.size * 2                                   # x (bf16)
        + (w1p.size + w2p.size + w3p.size) * 2        # weights (bf16)
        + (b1p.size + b2p.size + b3p.size) * 4        # biases (f32)
        + B_p * out_p * 4                             # output (f32)
    )

    out_padded = pl.pallas_call(
        mlp_kernel,
        out_shape=jax.ShapeDtypeStruct((B_p, out_p), out_dtype),
        grid_spec=pltpu.PrefetchScalarGridSpec(
            num_scalar_prefetch=0,
            grid=grid,
            in_specs=[
                pl.BlockSpec((tb, in_p), lambda i: (i, 0)),    # x tile
                pl.BlockSpec((in_p, h1_p), lambda i: (0, 0)),  # W1 (resident)
                pl.BlockSpec((1, h1_p), lambda i: (0, 0)),     # b1
                pl.BlockSpec((h1_p, h2_p), lambda i: (0, 0)),  # W2 (resident)
                pl.BlockSpec((1, h2_p), lambda i: (0, 0)),     # b2
                pl.BlockSpec((h2_p, out_p), lambda i: (0, 0)), # W3 (resident)
                pl.BlockSpec((1, out_p), lambda i: (0, 0)),    # b3
            ],
            out_specs=pl.BlockSpec((tb, out_p), lambda i: (i, 0)),
        ),
        compiler_params=pltpu.CompilerParams(
            dimension_semantics=("parallel",),   # shard batch tiles across TCs (v7x)
            vmem_limit_bytes=48 << 20,           # fits v7x 64 MiB, headroom on v5e/v6e
        ),
        cost_estimate=pl.CostEstimate(
            flops=flops, transcendentals=0, bytes_accessed=bytes_accessed),
    )(xp, w1p, b1p, w2p, b2p, w3p, b3p)

    # Strip batch / output-feature padding.
    return out_padded[:B, :out_dim]


def init_linear(key, in_features, out_features, dtype=jnp.float32):
    """Deterministic init mimicking torch.nn.Linear's uniform(-1/sqrt(in), 1/sqrt(in)).
    Weight is returned already transposed to [in, out]."""
    kw, kb = jax.random.split(key)
    bound = 1.0 / jnp.sqrt(jnp.float32(in_features))
    w = jax.random.uniform(kw, (in_features, out_features), dtype,
                           minval=-bound, maxval=bound)
    b = jax.random.uniform(kb, (1, out_features), dtype,
                           minval=-bound, maxval=bound)
    return w, b


if __name__ == "__main__":
    # Shapes consistent with the module's constructor signature.  Batch of 512
    # with tile_b=256 gives a 2-step "parallel" grid (both v7x TensorCores busy)
    # while staying tiny in absolute size.
    batch = 512
    input_size, hidden_size_1, hidden_size_2, output_size = 32, 64, 64, 16

    key = jax.random.PRNGKey(0)
    kx, k1, k2, k3 = jax.random.split(key, 4)

    x = jax.random.normal(kx, (batch, input_size), jnp.float32)
    params = (
        init_linear(k1, input_size, hidden_size_1),
        init_linear(k2, hidden_size_1, hidden_size_2),
        init_linear(k3, hidden_size_2, output_size),
    )

    out = mlp_forward(x, params)
    out = jax.block_until_ready(out)

    # Pure-JAX f32 reference of the same forward pass (kernel uses bf16 MXU
    # operands with f32 accumulation, so the tolerance is loosened).
    (w1, b1), (w2, b2), (w3, b3) = params
    ref = jnp.maximum(x @ w1 + b1, 0.0)
    ref = jnp.maximum(ref @ w2 + b2, 0.0)
    ref = ref @ w3 + b3

    assert out.shape == (batch, output_size)
    assert jnp.allclose(out, ref, atol=3e-2, rtol=3e-2), (
        float(jnp.max(jnp.abs(out - ref))))

    print("KERNEL_OK")
</pallas_src>

<mosaic_0001>
module attributes {stable_mosaic.version = 11 : i64} {
  func.func @mlp_kernel(%arg0: i32, %arg1: memref<256x128xbf16, #tpu.memory_space<vmem>>, %arg2: memref<128x128xbf16, #tpu.memory_space<vmem>>, %arg3: memref<1x128xf32, #tpu.memory_space<vmem>>, %arg4: memref<128x128xbf16, #tpu.memory_space<vmem>>, %arg5: memref<1x128xf32, #tpu.memory_space<vmem>>, %arg6: memref<128x128xbf16, #tpu.memory_space<vmem>>, %arg7: memref<1x128xf32, #tpu.memory_space<vmem>>, %arg8: memref<256x128xf32, #tpu.memory_space<vmem>>) attributes {dimension_semantics = [#tpu.dimension_semantics<parallel>], iteration_bounds = array<i64: 2>, scalar_prefetch = 0 : i64, scratch_operands = 0 : i64, tpu.core_type = #tpu.core_type<tc>, window_params = [{transform_indices = @transform_0, window_bounds = array<i64: 256, 128>}, {pipeline_mode = #tpu.pipeline_mode<synchronous>, transform_indices = @transform_1, window_bounds = array<i64: 128, 128>}, {pipeline_mode = #tpu.pipeline_mode<synchronous>, transform_indices = @transform_2, window_bounds = array<i64: 1, 128>}, {pipeline_mode = #tpu.pipeline_mode<synchronous>, transform_indices = @transform_3, window_bounds = array<i64: 128, 128>}, {pipeline_mode = #tpu.pipeline_mode<synchronous>, transform_indices = @transform_4, window_bounds = array<i64: 1, 128>}, {pipeline_mode = #tpu.pipeline_mode<synchronous>, transform_indices = @transform_5, window_bounds = array<i64: 128, 128>}, {pipeline_mode = #tpu.pipeline_mode<synchronous>, transform_indices = @transform_6, window_bounds = array<i64: 1, 128>}, {transform_indices = @transform_7, window_bounds = array<i64: 256, 128>}]} {
    %c0 = arith.constant 0 : index
    %c0_0 = arith.constant 0 : index
    %0 = vector.load %arg1[%c0, %c0_0] : memref<256x128xbf16, #tpu.memory_space<vmem>>, vector<256x128xbf16>
    %c0_1 = arith.constant 0 : index
    %c0_2 = arith.constant 0 : index
    %1 = vector.load %arg2[%c0_1, %c0_2] : memref<128x128xbf16, #tpu.memory_space<vmem>>, vector<128x128xbf16>
    %cst = arith.constant dense<0.000000e+00> : vector<256x128xf32>
    %2 = tpu.matmul %0, %1, %cst {dimension_numbers = #tpu.dot_dimension_numbers<[1], [0], [0], [1], [0, 0, 1, 1], [], []>} : vector<256x128xbf16>, vector<128x128xbf16>, vector<256x128xf32> -> vector<256x128xf32>
    %c0_3 = arith.constant 0 : index
    %c0_4 = arith.constant 0 : index
    %3 = vector.load %arg3[%c0_3, %c0_4] : memref<1x128xf32, #tpu.memory_space<vmem>>, vector<1x128xf32>
    %4 = vector.broadcast %3 : vector<1x128xf32> to vector<256x128xf32>
    %5 = arith.addf %2, %4 : vector<256x128xf32>
    %cst_5 = arith.constant 0.000000e+00 : f32
    %6 = vector.broadcast %cst_5 : f32 to vector<256x128xf32>
    %7 = arith.maximumf %5, %6 : vector<256x128xf32>
    %8 = arith.truncf %7 : vector<256x128xf32> to vector<256x128xbf16>
    %c0_6 = arith.constant 0 : index
    %c0_7 = arith.constant 0 : index
    %9 = vector.load %arg4[%c0_6, %c0_7] : memref<128x128xbf16, #tpu.memory_space<vmem>>, vector<128x128xbf16>
    %cst_8 = arith.constant dense<0.000000e+00> : vector<256x128xf32>
    %10 = tpu.matmul %8, %9, %cst_8 {dimension_numbers = #tpu.dot_dimension_numbers<[1], [0], [0], [1], [0, 0, 1, 1], [], []>} : vector<256x128xbf16>, vector<128x128xbf16>, vector<256x128xf32> -> vector<256x128xf32>
    %c0_9 = arith.constant 0 : index
    %c0_10 = arith.constant 0 : index
    %11 = vector.load %arg5[%c0_9, %c0_10] : memref<1x128xf32, #tpu.memory_space<vmem>>, vector<1x128xf32>
    %12 = vector.broadcast %11 : vector<1x128xf32> to vector<256x128xf32>
    %13 = arith.addf %10, %12 : vector<256x128xf32>
    %cst_11 = arith.constant 0.000000e+00 : f32
    %14 = vector.broadcast %cst_11 : f32 to vector<256x128xf32>
    %15 = arith.maximumf %13, %14 : vector<256x128xf32>
    %16 = arith.truncf %15 : vector<256x128xf32> to vector<256x128xbf16>
    %c0_12 = arith.constant 0 : index
    %c0_13 = arith.constant 0 : index
    %17 = vector.load %arg6[%c0_12, %c0_13] : memref<128x128xbf16, #tpu.memory_space<vmem>>, vector<128x128xbf16>
    %cst_14 = arith.constant dense<0.000000e+00> : vector<256x128xf32>
    %18 = tpu.matmul %16, %17, %cst_14 {dimension_numbers = #tpu.dot_dimension_numbers<[1], [0], [0], [1], [0, 0, 1, 1], [], []>} : vector<256x128xbf16>, vector<128x128xbf16>, vector<256x128xf32> -> vector<256x128xf32>
    %c0_15 = arith.constant 0 : index
    %c0_16 = arith.constant 0 : index
    %19 = vector.load %arg7[%c0_15, %c0_16] : memref<1x128xf32, #tpu.memory_space<vmem>>, vector<1x128xf32>
    %20 = vector.broadcast %19 : vector<1x128xf32> to vector<256x128xf32>
    %21 = arith.addf %18, %20 : vector<256x128xf32>
    %c0_17 = arith.constant 0 : index
    %c0_18 = arith.constant 0 : index
    %22 = vector.load %arg8[%c0_17, %c0_18] : memref<256x128xf32, #tpu.memory_space<vmem>>, vector<256x128xf32>
    tpu.vector_store %arg8[%c0_17, %c0_18], %21 {strides = array<i32>} : memref<256x128xf32, #tpu.memory_space<vmem>>, vector<256x128xf32>,
    return
  }
  func.func @transform_0(%arg0: i32) -> (i32, i32) {
    %c0_i32 = arith.constant 0 : i32
    %c0_i32_0 = arith.constant 0 : i32
    return %arg0, %c0_i32 : i32, i32
  }
  func.func @transform_1(%arg0: i32) -> (i32, i32) {
    %c0_i32 = arith.constant 0 : i32
    %c0_i32_0 = arith.constant 0 : i32
    %c0_i32_1 = arith.constant 0 : i32
    return %c0_i32, %c0_i32_0 : i32, i32
  }
  func.func @transform_2(%arg0: i32) -> (i32, i32) {
    %c0_i32 = arith.constant 0 : i32
    %c0_i32_0 = arith.constant 0 : i32
    %c0_i32_1 = arith.constant 0 : i32
    return %c0_i32, %c0_i32_0 : i32, i32
  }
  func.func @transform_3(%arg0: i32) -> (i32, i32) {
    %c0_i32 = arith.constant 0 : i32
    %c0_i32_0 = arith.constant 0 : i32
    %c0_i32_1 = arith.constant 0 : i32
    return %c0_i32, %c0_i32_0 : i32, i32
  }
  func.func @transform_4(%arg0: i32) -> (i32, i32) {
    %c0_i32 = arith.constant 0 : i32
    %c0_i32_0 = arith.constant 0 : i32
    %c0_i32_1 = arith.constant 0 : i32
    return %c0_i32, %c0_i32_0 : i32, i32
  }
  func.func @transform_5(%arg0: i32) -> (i32, i32) {
    %c0_i32 = arith.constant 0 : i32
    %c0_i32_0 = arith.constant 0 : i32
    %c0_i32_1 = arith.constant 0 : i32
    return %c0_i32, %c0_i32_0 : i32, i32
  }
  func.func @transform_6(%arg0: i32) -> (i32, i32) {
    %c0_i32 = arith.constant 0 : i32
    %c0_i32_0 = arith.constant 0 : i32
    %c0_i32_1 = arith.constant 0 : i32
    return %c0_i32, %c0_i32_0 : i32, i32
  }
  func.func @transform_7(%arg0: i32) -> (i32, i32) {
    %c0_i32 = arith.constant 0 : i32
    %c0_i32_0 = arith.constant 0 : i32
    return %arg0, %c0_i32 : i32, i32
  }
}

</mosaic_0001>

<bundles_post_ra>
// kernel: mlp_forward.1
= control target key start
LH: loop header
LB: loop body
LE: loop exit
PB: predicated region body
PF: predicated region fallthrough
CT: control target
= control target key end

     0   :  { %s1673_s24 = smov 0   ;;  %s1944_s0 = inlined_call_operand.vmem [shape: bf16[512,128], index: 0, kind: input, shape index: {}]   ;;  %s1945_s1 = inlined_call_operand.vmem [shape: bf16[128,128], index: 1, kind: input, shape index: {}]   ;;  %s1946_s2 = inlined_call_operand.vmem [shape: f32[1,128], index: 2, kind: input, shape index: {}]   ;;  %s1947_s3 = inlined_call_operand.vmem [shape: bf16[128,128], index: 3, kind: input, shape index: {}]   ;;  %s1948_s4 = inlined_call_operand.vmem [shape: f32[1,128], index: 4, kind: input, shape index: {}]   ;;  %s1949_s5 = inlined_call_operand.vmem [shape: bf16[128,128], index: 5, kind: input, shape index: {}]   ;;  %s1950_s6 = inlined_call_operand.vmem [shape: f32[1,128], index: 6, kind: input, shape index: {}]   ;;  %s1951_s7 = inlined_call_operand.vmem [shape: f32[512,128], index: 7, kind: output, shape index: {}]  }
   0x1 LB: > { %s1291_s25 = sadd.s32 4294967295, %s1631_s24   ;;  %p1295_p0 = scmp.ge.s32.totalorder %s1631_s24, 1  ;;  %s1631_s24 = sphi %s1673_s24, %s17_s24  }
   0x2   : > { %p238_p1 = scmp.lt.s32.totalorder %s1631_s24, 3 }
   0x4   : > { %p239_p2 = pnand %p1295_p0, %p238_p1 }
   0x5   : > { %s1296_s28 = sshll.u32 (!%p239_p2), %s1291_s25, 5 }
   0x6   : > { %242 = sbr.rel (%p239_p2) target bundleno = 714 (0x2ca), region = 48  ;;  %p271_p3 = scmp.lt.s32.totalorder (!%p239_p2), %s1296_s28, 63 }
   0xb   : > { %v1585_v0 = vld [vmem:[%s1945_s1 + $0x38] sm:$0xff]   ;;  %v1586_v1 = vld [vmem:[%s1945_s1 + $0x30] sm:$0xff]   ;;  %s1953_s28 = smov (!%p271_p3, %s1296_s28), 63  ;;  %v1587_v2 = vld [vmem:[%s1945_s1 + $0x28] sm:$0xff]  }
   0xc   : > { %1417 = vmatprep.subr.bf16.mxu0 %v1585_v0  ;;  %1561 = vmatprep.subr.bf16.mxu1 %v1585_v0  ;;  %s1297_s10 = sshll.u32 %s1953_s28, 2  ;;  %v1588_v3 = vld [vmem:[%s1945_s1 + $0x20] sm:$0xff]   ;;  %v1589_v5 = vld [vmem:[%s1945_s1 + $0x18] sm:$0xff]   ;;  %v1590_v6 = vld [vmem:[%s1945_s1 + $0x10] sm:$0xff]   ;;  %s1299_s19 = sshll.u32 %s1953_s28, 3 }
   0xd   : > { %1418 = vmatpush3.bf16.msra.mxu0 %v1585_v0  ;;  %1569 = vmatpush3.bf16.msra.mxu1 %v1585_v0  ;;  %s1696_s13 = scalar_lea.vmem %s1944_s0, %s1297_s10  ;;  %v1591_v8 = vld [vmem:[%s1945_s1 + $0x8] sm:$0xff]   ;;  %v1592_v9 = vld [vmem:[%s1945_s1] sm:$0xff]   ;;  %v1609_v12 = vld [vmem:[%s1947_s3 + $0x38] sm:$0xff]   ;;  %s1875_s23 = scalar_lea.vmem %s1951_s7, %s1299_s19 }
   0xe   : > { %1419 = vmatprep.subr.bf16.mxu0 %v1586_v1  ;;  %1562 = vmatprep.subr.bf16.mxu1 %v1586_v1  ;;  %v1593_v4 = vld [vmem:[%s1696_s13] sm:$0xff]   ;;  %v1594_v10 = vld [vmem:[%s1696_s13 + $0x8] sm:$0xff]   ;;  %v1595_v13 = vld [vmem:[%s1696_s13 + $0x10] sm:$0xff]  }
   0xf   : > { %1433 = vmatprep.mubr.bf16.mxu0 %v1593_v4  ;;  %v1601_v7 = vld [vmem:[%s1696_s13 + $0x40] sm:$0xff]   ;;  %v1602_v11 = vld [vmem:[%s1696_s13 + $0x48] sm:$0xff]   ;;  %v1603_v14 = vld [vmem:[%s1696_s13 + $0x50] sm:$0xff]  }
  0x10   : > { %1449 = vmatprep.mubr.bf16.mxu1 %v1601_v7  ;;  %v1610_v15 = vld [vmem:[%s1947_s3 + $0x30] sm:$0xff]   ;;  %v1611_v16 = vld [vmem:[%s1947_s3 + $0x28] sm:$0xff]   ;;  %v1596_v17 = vld [vmem:[%s1696_s13 + $0x18] sm:$0xff]  }
  0x11   : > { %1420 = vmatpush3.bf16.msra.mxu0 %v1586_v1  ;;  %1570 = vmatpush3.bf16.msra.mxu1 %v1586_v1  ;;  %v1604_v18 = vld [vmem:[%s1696_s13 + $0x58] sm:$0xff]   ;;  %v1597_v19 = vld [vmem:[%s1696_s13 + $0x20] sm:$0xff]   ;;  %v1598_v23 = vld [vmem:[%s1696_s13 + $0x28] sm:$0xff]  }
  0x12   : > { %1421 = vmatprep.subr.bf16.mxu0 %v1587_v2  ;;  %1563 = vmatprep.subr.bf16.mxu1 %v1587_v2  ;;  %v1605_v20 = vld [vmem:[%s1696_s13 + $0x60] sm:$0xff]   ;;  %v1613_v22 = vld [vmem:[%s1947_s3 + $0x18] sm:$0xff]   ;;  %v1606_v24 = vld [vmem:[%s1696_s13 + $0x68] sm:$0xff]  }
  0x13   : > { %v1612_v21 = vld [vmem:[%s1947_s3 + $0x20] sm:$0xff]   ;;  %v1599_v25 = vld [vmem:[%s1696_s13 + $0x30] sm:$0xff]   ;;  %v1600_v27 = vld [vmem:[%s1696_s13 + $0x38] sm:$0xff]  }
  0x14   : > { %v1607_v26 = vld [vmem:[%s1696_s13 + $0x70] sm:$0xff]   ;;  %v1608_v28 = vld [vmem:[%s1696_s13 + $0x78] sm:$0xff]   ;;  %v1615_v30 = vld [vmem:[%s1947_s3 + $0x8] sm:$0xff]  }
  0x15   : > { %1422 = vmatpush3.bf16.msra.mxu0 %v1587_v2  ;;  %1571 = vmatpush3.bf16.msra.mxu1 %v1587_v2  ;;  %v1614_v29 = vld [vmem:[%s1947_s3 + $0x10] sm:$0xff]   ;;  %v1616_v31 = vld [vmem:[%s1947_s3] sm:$0xff]   ;;  %v1617_v32 = vld [vmem:[%s1949_s5 + $0x38] sm:$0xff]  }
  0x16   : > { %1423 = vmatprep.subr.bf16.mxu0 %v1588_v3  ;;  %1564 = vmatprep.subr.bf16.mxu1 %v1588_v3  ;;  %v1618_v33 = vld [vmem:[%s1949_s5 + $0x30] sm:$0xff]   ;;  %v1619_v34 = vld [vmem:[%s1949_s5 + $0x28] sm:$0xff]   ;;  %v1620_v35 = vld [vmem:[%s1949_s5 + $0x20] sm:$0xff]  }
  0x17   : > { %v1621_v36 = vld [vmem:[%s1949_s5 + $0x18] sm:$0xff]   ;;  %v1773_v41 = vld [vmem:[%s1946_s2] ss:$0 sm:$0xff] }
  0x19   : > { %1424 = vmatpush3.bf16.msra.mxu0 %v1588_v3  ;;  %1572 = vmatpush3.bf16.msra.mxu1 %v1588_v3 }
  0x1a   : > { %1425 = vmatprep.subr.bf16.mxu0 %v1589_v5  ;;  %1565 = vmatprep.subr.bf16.mxu1 %v1589_v5 }
  0x1d   : > { %1426 = vmatpush3.bf16.msra.mxu0 %v1589_v5  ;;  %1573 = vmatpush3.bf16.msra.mxu1 %v1589_v5 }
  0x1e   : > { %1427 = vmatprep.subr.bf16.mxu0 %v1590_v6  ;;  %1566 = vmatprep.subr.bf16.mxu1 %v1590_v6 }
  0x21   : > { %1428 = vmatpush3.bf16.msra.mxu0 %v1590_v6  ;;  %1574 = vmatpush3.bf16.msra.mxu1 %v1590_v6 }
  0x22   : > { %1429 = vmatprep.subr.bf16.mxu0 %v1591_v8  ;;  %1567 = vmatprep.subr.bf16.mxu1 %v1591_v8 }
  0x25   : > { %1430 = vmatpush3.bf16.msra.mxu0 %v1591_v8  ;;  %1575 = vmatpush3.bf16.msra.mxu1 %v1591_v8 }
  0x26   : > { %1431 = vmatprep.subr.bf16.mxu0 %v1592_v9  ;;  %1568 = vmatprep.subr.bf16.mxu1 %v1592_v9 }
  0x29   : > { %1432 = vmatpush3.bf16.msra.mxu0 %v1592_v9  ;;  %1576 = vmatpush3.bf16.msra.mxu1 %v1592_v9 }
  0x2a   : > { %1465 = vmatprep.subr.bf16.mxu1 %v1609_v12  ;;  %1513 = vmatprep.subr.bf16.mxu0 %v1617_v32 }
  0x2c   : > { %1434 = vmatmul.mubr.bf16.vlgmr.msra.gmra.mxu0 %v1594_v10  ;;  %1450 = vmatmul.mubr.bf16.vlgmr.msra.gmra.mxu1 %v1602_v11 }
  0x2d   : > { %1437 = vmatprep.mubr.bf16.mxu0 %v1595_v13  ;;  %1453 = vmatprep.mubr.bf16.mxu1 %v1603_v14 }
  0x2e   : > { %1466 = vmatpush3.bf16.msra.mxu1 %v1609_v12  ;;  %1514 = vmatpush3.bf16.msra.mxu0 %v1617_v32 }
  0x2f   : > { %1467 = vmatprep.subr.bf16.mxu1 %v1610_v15  ;;  %1515 = vmatprep.subr.bf16.mxu0 %v1618_v33 }
  0x32   : > { %1468 = vmatpush3.bf16.msra.mxu1 %v1610_v15  ;;  %1516 = vmatpush3.bf16.msra.mxu0 %v1618_v33 }
  0x33   : > { %1469 = vmatprep.subr.bf16.mxu1 %v1611_v16  ;;  %1517 = vmatprep.subr.bf16.mxu0 %v1619_v34 }
  0x34   : > { %1438 = vmatmul.mubr.bf16.gmra.mxu0 %v1596_v17  ;;  %1454 = vmatmul.mubr.bf16.gmra.mxu1 %v1604_v18 }
  0x35   : > { %1441 = vmatprep.mubr.bf16.mxu0 %v1597_v19  ;;  %1457 = vmatprep.mubr.bf16.mxu1 %v1605_v20 }
  0x36   : > { %1470 = vmatpush3.bf16.msra.mxu1 %v1611_v16  ;;  %1518 = vmatpush3.bf16.msra.mxu0 %v1619_v34 }
  0x37   : > { %1471 = vmatprep.subr.bf16.mxu1 %v1612_v21  ;;  %1519 = vmatprep.subr.bf16.mxu0 %v1620_v35 }
  0x3a   : > { %1472 = vmatpush3.bf16.msra.mxu1 %v1612_v21  ;;  %1520 = vmatpush3.bf16.msra.mxu0 %v1620_v35 }
  0x3b   : > { %1473 = vmatprep.subr.bf16.mxu1 %v1613_v22  ;;  %1521 = vmatprep.subr.bf16.mxu0 %v1621_v36 }
  0x3c   : > { %1442 = vmatmul.mubr.bf16.gmra.mxu0 %v1598_v23  ;;  %1458 = vmatmul.mubr.bf16.gmra.mxu1 %v1606_v24 }
  0x3d   : > { %1445 = vmatprep.mubr.bf16.mxu0 %v1599_v25  ;;  %1461 = vmatprep.mubr.bf16.mxu1 %v1607_v26 }
  0x3e   : > { %1474 = vmatpush3.bf16.msra.mxu1 %v1613_v22  ;;  %1522 = vmatpush3.bf16.msra.mxu0 %v1621_v36 }
  0x3f   : > { %1475 = vmatprep.subr.bf16.mxu1 %v1614_v29 }
  0x42   : > { %1476 = vmatpush3.bf16.msra.mxu1 %v1614_v29 }
  0x43   : > { %1477 = vmatprep.subr.bf16.mxu1 %v1615_v30 }
  0x44   : > { %1446 = vmatmul.mubr.bf16.gmra.mxu0 %v1600_v27  ;;  %1462 = vmatmul.mubr.bf16.gmra.mxu1 %v1608_v28 }
  0x46   : > { %1478 = vmatpush3.bf16.msra.mxu1 %v1615_v30 }
  0x47   : > { %1479 = vmatprep.subr.bf16.mxu1 %v1616_v31 }
  0x4a   : > { %1480 = vmatpush3.bf16.msra.mxu1 %v1616_v31 }
  0xec   : > { %v1435_v37 = vpop.f32.mrf.mxu0  ;;  %v1768_v38 = vpop.f32.mrf.mxu1 }
  0xed   : > { %v525_v46 = vadd.f32 %v1435_v37, %v1773_v41 }
  0xee   : > { %v516_v39 = vpop.f32.mrf.mxu0  ;;  %v580_v40 = vpop.f32.mrf.mxu1 }
  0xef   : > { %v517_v44 = vadd.f32 %v1773_v41, %v516_v39  ;;  %v645_v55 = vmax.f32 %v525_v46, 0.0  ;;  %v581_v27 = vadd.f32 %v1773_v41, %v580_v40 }
  0xf0   : > { %v1436_v42 = vpop.f32.mrf.mxu0  ;;  %v1775_v43 = vpop.f32.mrf.mxu1 }
  0xf1   : > { %v528_v45 = vadd.f32 %v1436_v42, %v1773_v41  ;;  %v643_v53 = vmax.f32 %v517_v44, 0.0  ;;  %v659_v36 = vmax.f32 %v581_v27, 0.0  ;;  %v1832_v27 = vld [vmem:[%s1948_s4] ss:$0 sm:$0xff] }
  0xf2   : > { %v519_v47 = vpop.f32.mrf.mxu0  ;;  %v583_v48 = vpop.f32.mrf.mxu1 }
  0xf3   : > { %v520_v49 = vadd.f32 %v1773_v41, %v519_v47  ;;  %v646_v50 = vmax.f32 %v528_v45, 0.0  ;;  %v584_v28 = vadd.f32 %v1773_v41, %v583_v48 }
  0xf4   : > { %v1439_v51 = vpop.f32.mrf.mxu0  ;;  %v1781_v52 = vpop.f32.mrf.mxu1 }
  0xf5   : > { %v644_v54 = vmax.f32 %v520_v49, 0.0  ;;  %v676_v59 = vpack.c.bf16 %v646_v50, %v645_v55  ;;  %v541_v0 = vadd.f32 %v1439_v51, %v1773_v41  ;;  %v660_v39 = vmax.f32 %v584_v28, 0.0 }
  0xf6   : > { %v532_v56 = vpop.f32.mrf.mxu0  ;;  %v596_v57 = vpop.f32.mrf.mxu1  ;;  %v589_v51 = vadd.f32 %v1768_v38, %v1773_v41  ;;  %v605_v38 = vadd.f32 %v1781_v52, %v1773_v41 }
  0xf7   : > { %v675_v58 = vpack.c.bf16 %v644_v54, %v643_v53  ;;  %v533_v62 = vadd.f32 %v1773_v41, %v532_v56  ;;  %v649_v8 = vmax.f32 %v541_v0, 0.0  ;;  %v683_v48 = vpack.c.bf16 %v660_v39, %v659_v36 }
  0xf8   : > { %v1440_v60 = vpop.f32.mrf.mxu0  ;;  %v1783_v61 = vpop.f32.mrf.mxu1  ;;  %v597_v49 = vadd.f32 %v1773_v41, %v596_v57  ;;  %v592_v54 = vadd.f32 %v1775_v43, %v1773_v41 }
  0xf9   : > { %v544_v63 = vadd.f32 %v1440_v60, %v1773_v41  ;;  %1481 = vmatprep.mubr.bf16.mxu1 %v675_v58  ;;  %v647_v6 = vmax.f32 %v533_v62, 0.0  ;;  %v608_v43 = vadd.f32 %v1783_v61, %v1773_v41 }
  0xfa   : > { %v535_v1 = vpop.f32.mrf.mxu0  ;;  %1482 = vmatmul.mubr.bf16.vlgmr.msra.gmra.mxu1 %v676_v59  ;;  %v599_v5 = vpop.f32.mrf.mxu1  ;;  %v663_v56 = vmax.f32 %v597_v49, 0.0  ;;  %v661_v59 = vmax.f32 %v589_v51, 0.0  ;;  %v662_v60 = vmax.f32 %v592_v54, 0.0 }
  0xfb   : > { %v536_v2 = vadd.f32 %v1773_v41, %v535_v1  ;;  %v650_v3 = vmax.f32 %v544_v63, 0.0  ;;  %v600_v50 = vadd.f32 %v1773_v41, %v599_v5  ;;  %v665_v5 = vmax.f32 %v605_v38, 0.0 }
  0xfc   : > { %v1443_v4 = vpop.f32.mrf.mxu0  ;;  %v1789_v13 = vpop.f32.mrf.mxu1  ;;  %v684_v1 = vpack.c.bf16 %v662_v60, %v661_v59 }
  0xfd   : > { %v648_v7 = vmax.f32 %v536_v2, 0.0  ;;  %v678_v11 = vpack.c.bf16 %v650_v3, %v649_v8  ;;  %v557_v16 = vadd.f32 %v1443_v4, %v1773_v41  ;;  %v664_v58 = vmax.f32 %v600_v50, 0.0 }
  0xfe   : > { %v548_v9 = vpop.f32.mrf.mxu0  ;;  %v612_v21 = vpop.f32.mrf.mxu1  ;;  %v621_v52 = vadd.f32 %v1789_v13, %v1773_v41  ;;  %v1622_v13 = vld [vmem:[%s1949_s5 + $0x10] sm:$0xff]  }
  0xff   : > { %v677_v10 = vpack.c.bf16 %v648_v7, %v647_v6  ;;  %v549_v14 = vadd.f32 %v1773_v41, %v548_v9  ;;  %v653_v24 = vmax.f32 %v557_v16, 0.0  ;;  %v685_v63 = vpack.c.bf16 %v664_v58, %v663_v56  ;;  %1523 = vmatprep.subr.bf16.mxu0 %v1622_v13 }
 0x100   : > { %v1444_v12 = vpop.f32.mrf.mxu0  ;;  %v1460_v31 = vpop.f32.mrf.mxu1  ;;  %v613_v57 = vadd.f32 %v1773_v41, %v612_v21  ;;  %v666_v6 = vmax.f32 %v608_v43, 0.0  ;;  %1524 = vmatpush3.bf16.msra.mxu0 %v1622_v13 }
 0x101   : > { %v560_v15 = vadd.f32 %v1444_v12, %v1773_v41  ;;  %1485 = vmatprep.mubr.bf16.mxu1 %v677_v10  ;;  %v651_v22 = vmax.f32 %v549_v14, 0.0  ;;  %v624_v12 = vadd.f32 %v1460_v31, %v1773_v41 }
 0x102   : > { %v551_v17 = vpop.f32.mrf.mxu0  ;;  %1486 = vmatmul.mubr.bf16.gmra.mxu1 %v678_v11  ;;  %v615_v40 = vpop.f32.mrf.mxu1  ;;  %v667_v3 = vmax.f32 %v613_v57, 0.0  ;;  %v686_v11 = vpack.c.bf16 %v666_v6, %v665_v5 }
 0x103   : > { %v552_v18 = vadd.f32 %v1773_v41, %v551_v17  ;;  %v654_v19 = vmax.f32 %v560_v15, 0.0  ;;  %v616_v0 = vadd.f32 %v1773_v41, %v615_v40  ;;  %v669_v15 = vmax.f32 %v621_v52, 0.0 }
 0x104   : > { %v1447_v20 = vpop.f32.mrf.mxu0  ;;  %v1463_v55 = vpop.f32.mrf.mxu1  ;;  %v670_v16 = vmax.f32 %v624_v12, 0.0 }
 0x105   : > { %v652_v23 = vmax.f32 %v552_v18, 0.0  ;;  %v680_v29 = vpack.c.bf16 %v654_v19, %v653_v24  ;;  %v573_v34 = vadd.f32 %v1447_v20, %v1773_v41  ;;  %v668_v4 = vmax.f32 %v616_v0, 0.0  ;;  %v1623_v24 = vld [vmem:[%s1949_s5 + $0x8] sm:$0xff]  }
 0x106   : > { %v564_v25 = vpop.f32.mrf.mxu0  ;;  %v628_v62 = vpop.f32.mrf.mxu1  ;;  %v688_v18 = vpack.c.bf16 %v670_v16, %v669_v15  ;;  %v637_v19 = vadd.f32 %v1463_v55, %v1773_v41  ;;  %1525 = vmatprep.subr.bf16.mxu0 %v1623_v24 }
 0x107   : > { %v679_v26 = vpack.c.bf16 %v652_v23, %v651_v22  ;;  %v565_v32 = vadd.f32 %v1773_v41, %v564_v25  ;;  %v657_v46 = vmax.f32 %v573_v34, 0.0  ;;  %v687_v8 = vpack.c.bf16 %v668_v4, %v667_v3  ;;  %1526 = vmatpush3.bf16.msra.mxu0 %v1623_v24 }
 0x108   : > { %v1448_v30 = vpop.f32.mrf.mxu0  ;;  %v1464_v2 = vpop.f32.mrf.mxu1  ;;  %v629_v9 = vadd.f32 %v1773_v41, %v628_v62  ;;  %v673_v21 = vmax.f32 %v637_v19, 0.0 }
 0x109   : > { %v576_v33 = vadd.f32 %v1448_v30, %v1773_v41  ;;  %1489 = vmatprep.mubr.bf16.mxu1 %v679_v26  ;;  %v655_v44 = vmax.f32 %v565_v32, 0.0  ;;  %v640_v20 = vadd.f32 %v1464_v2, %v1773_v41 }
 0x10a   : > { %v567_v35 = vpop.f32.mrf.mxu0  ;;  %1490 = vmatmul.mubr.bf16.gmra.mxu1 %v680_v29  ;;  %v631_v7 = vpop.f32.mrf.mxu1  ;;  %v671_v61 = vmax.f32 %v629_v9, 0.0 }
 0x10b   : > { %v568_v37 = vadd.f32 %v1773_v41, %v567_v35  ;;  %v658_v42 = vmax.f32 %v576_v33, 0.0  ;;  %v632_v10 = vadd.f32 %v1773_v41, %v631_v7  ;;  %v674_v22 = vmax.f32 %v640_v20, 0.0  ;;  %v1624_v41 = vld [vmem:[%s1949_s5] sm:$0xff]  }
 0x10c   : > { %1527 = vmatprep.subr.bf16.mxu0 %v1624_v41 }
 0x10d   : > { %v656_v45 = vmax.f32 %v568_v37, 0.0  ;;  %v682_v53 = vpack.c.bf16 %v658_v42, %v657_v46  ;;  %v672_v14 = vmax.f32 %v632_v10, 0.0  ;;  %v690_v23 = vpack.c.bf16 %v674_v22, %v673_v21  ;;  %1528 = vmatpush3.bf16.msra.mxu0 %v1624_v41 }
 0x10f   : > { %v681_v47 = vpack.c.bf16 %v656_v45, %v655_v44  ;;  %v689_v17 = vpack.c.bf16 %v672_v14, %v671_v61 }
 0x111   : > { %1493 = vmatprep.mubr.bf16.mxu1 %v681_v47 }
 0x112   : > { %1494 = vmatmul.mubr.bf16.gmra.mxu1 %v682_v53 }
 0x113   : > { %1497 = vmatprep.mubr.bf16.mxu1 %v683_v48 }
 0x11a   : > { %1498 = vmatmul.mubr.bf16.gmra.mxu1 %v684_v1 }
 0x11b   : > { %1501 = vmatprep.mubr.bf16.mxu1 %v685_v63 }
 0x122   : > { %1502 = vmatmul.mubr.bf16.gmra.mxu1 %v686_v11 }
 0x123   : > { %1505 = vmatprep.mubr.bf16.mxu1 %v687_v8 }
 0x12a   : > { %1506 = vmatmul.mubr.bf16.gmra.mxu1 %v688_v18 }
 0x12b   : > { %1509 = vmatprep.mubr.bf16.mxu1 %v689_v17 }
 0x132   : > { %1510 = vmatmul.mubr.bf16.gmra.mxu1 %v690_v23 }
 0x1ba   : > { %v1483_v25 = vpop.f32.mrf.mxu1 }
 0x1bb   : > { %v805_v31 = vadd.f32 %v1483_v25, %v1832_v27 }
 0x1bc   : > { %v796_v26 = vpop.f32.mrf.mxu1 }
 0x1bd   : > { %v797_v29 = vadd.f32 %v1832_v27, %v796_v26  ;;  %v925_v39 = vmax.f32 %v805_v31, 0.0 }
 0x1be   : > { %v1484_v28 = vpop.f32.mrf.mxu1 }
 0x1bf   : > { %v808_v30 = vadd.f32 %v1484_v28, %v1832_v27  ;;  %v923_v36 = vmax.f32 %v797_v29, 0.0 }
 0x1c0   : > { %v799_v32 = vpop.f32.mrf.mxu1 }
 0x1c1   : > { %v800_v33 = vadd.f32 %v1832_v27, %v799_v32  ;;  %v926_v34 = vmax.f32 %v808_v30, 0.0 }
 0x1c2   : > { %v1487_v35 = vpop.f32.mrf.mxu1 }
 0x1c3   : > { %v924_v37 = vmax.f32 %v800_v33, 0.0  ;;  %v956_v44 = vpack.c.bf16 %v926_v34, %v925_v39  ;;  %v821_v48 = vadd.f32 %v1487_v35, %v1832_v27 }
 0x1c4   : > { %v812_v42 = vpop.f32.mrf.mxu1 }
 0x1c5   : > { %v955_v40 = vpack.c.bf16 %v924_v37, %v923_v36  ;;  %v813_v46 = vadd.f32 %v1832_v27, %v812_v42  ;;  %v929_v56 = vmax.f32 %v821_v48, 0.0 }
 0x1c6   : > { %v1488_v45 = vpop.f32.mrf.mxu1 }
 0x1c7   : > { %v824_v47 = vadd.f32 %v1488_v45, %v1832_v27  ;;  %1529 = vmatprep.mubr.bf16.mxu0 %v955_v40  ;;  %v927_v54 = vmax.f32 %v813_v46, 0.0 }
 0x1c8   : > { %v815_v49 = vpop.f32.mrf.mxu1  ;;  %1530 = vmatmul.mubr.bf16.vlgmr.msra.gmra.mxu0 %v956_v44 }
 0x1c9   : > { %v816_v50 = vadd.f32 %v1832_v27, %v815_v49  ;;  %v930_v51 = vmax.f32 %v824_v47, 0.0 }
 0x1ca   : > { %v1491_v53 = vpop.f32.mrf.mxu1 }
 0x1cb   : > { %v928_v55 = vmax.f32 %v816_v50, 0.0  ;;  %v958_v60 = vpack.c.bf16 %v930_v51, %v929_v56  ;;  %v837_v0 = vadd.f32 %v1491_v53, %v1832_v27 }
 0x1cc   : > { %v828_v58 = vpop.f32.mrf.mxu1 }
 0x1cd   : > { %v957_v59 = vpack.c.bf16 %v928_v55, %v927_v54  ;;  %v829_v63 = vadd.f32 %v1832_v27, %v828_v58  ;;  %v933_v5 = vmax.f32 %v837_v0, 0.0 }
 0x1ce   : > { %v1492_v62 = vpop.f32.mrf.mxu1 }
 0x1cf   : > { %v840_v57 = vadd.f32 %v1492_v62, %v1832_v27  ;;  %1533 = vmatprep.mubr.bf16.mxu0 %v957_v59  ;;  %v931_v3 = vmax.f32 %v829_v63, 0.0 }
 0x1d0   : > { %v831_v1 = vpop.f32.mrf.mxu1  ;;  %1534 = vmatmul.mubr.bf16.gmra.mxu0 %v958_v60 }
 0x1d1   : > { %v832_v38 = vadd.f32 %v1832_v27, %v831_v1  ;;  %v934_v43 = vmax.f32 %v840_v57, 0.0 }
 0x1d2   : > { %v1495_v2 = vpop.f32.mrf.mxu1 }
 0x1d3   : > { %v932_v4 = vmax.f32 %v832_v38, 0.0  ;;  %v960_v8 = vpack.c.bf16 %v934_v43, %v933_v5  ;;  %v853_v52 = vadd.f32 %v1495_v2, %v1832_v27 }
 0x1d4   : > { %v844_v6 = vpop.f32.mrf.mxu1 }
 0x1d5   : > { %v959_v7 = vpack.c.bf16 %v932_v4, %v931_v3  ;;  %v845_v10 = vadd.f32 %v1832_v27, %v844_v6  ;;  %v937_v18 = vmax.f32 %v853_v52, 0.0 }
 0x1d6   : > { %v1496_v9 = vpop.f32.mrf.mxu1 }
 0x1d7   : > { %v856_v11 = vadd.f32 %v1496_v9, %v1832_v27  ;;  %1537 = vmatprep.mubr.bf16.mxu0 %v959_v7  ;;  %v935_v16 = vmax.f32 %v845_v10, 0.0 }
 0x1d8   : > { %v847_v12 = vpop.f32.mrf.mxu1  ;;  %1538 = vmatmul.mubr.bf16.gmra.mxu0 %v960_v8 }
 0x1d9   : > { %v848_v61 = vadd.f32 %v1832_v27, %v847_v12  ;;  %v938_v14 = vmax.f32 %v856_v11, 0.0 }
 0x1da   : > { %v1499_v15 = vpop.f32.mrf.mxu1 }
 0x1db   : > { %v936_v17 = vmax.f32 %v848_v61, 0.0  ;;  %v962_v21 = vpack.c.bf16 %v938_v14, %v937_v18  ;;  %v869_v24 = vadd.f32 %v1499_v15, %v1832_v27  ;;  %v1870_v61 = vld [vmem:[%s1950_s6] ss:$0 sm:$0xff] }
 0x1dc   : > { %v860_v19 = vpop.f32.mrf.mxu1 }
 0x1dd   : > { %v961_v20 = vpack.c.bf16 %v936_v17, %v935_v16  ;;  %v861_v23 = vadd.f32 %v1832_v27, %v860_v19  ;;  %v941_v31 = vmax.f32 %v869_v24, 0.0 }
 0x1de   : > { %v1500_v22 = vpop.f32.mrf.mxu1 }
 0x1df   : > { %v872_v13 = vadd.f32 %v1500_v22, %v1832_v27  ;;  %1541 = vmatprep.mubr.bf16.mxu0 %v961_v20  ;;  %v939_v29 = vmax.f32 %v861_v23, 0.0 }
 0x1e0   : > { %v863_v41 = vpop.f32.mrf.mxu1  ;;  %1542 = vmatmul.mubr.bf16.gmra.mxu0 %v962_v21 }
 0x1e1   : > { %v864_v25 = vadd.f32 %v1832_v27, %v863_v41  ;;  %v942_v26 = vmax.f32 %v872_v13, 0.0 }
 0x1e2   : > { %v1503_v28 = vpop.f32.mrf.mxu1 }
 0x1e3   : > { %v940_v30 = vmax.f32 %v864_v25, 0.0  ;;  %v964_v34 = vpack.c.bf16 %v942_v26, %v941_v31  ;;  %v885_v39 = vadd.f32 %v1503_v28, %v1832_v27 }
 0x1e4   : > { %v876_v32 = vpop.f32.mrf.mxu1 }
 0x1e5   : > { %v963_v33 = vpack.c.bf16 %v940_v30, %v939_v29  ;;  %v877_v36 = vadd.f32 %v1832_v27, %v876_v32  ;;  %v945_v48 = vmax.f32 %v885_v39, 0.0 }
 0x1e6   : > { %v1504_v35 = vpop.f32.mrf.mxu1 }
 0x1e7   : > { %v888_v37 = vadd.f32 %v1504_v35, %v1832_v27  ;;  %1545 = vmatprep.mubr.bf16.mxu0 %v963_v33  ;;  %v943_v46 = vmax.f32 %v877_v36, 0.0 }
 0x1e8   : > { %v879_v42 = vpop.f32.mrf.mxu1  ;;  %1546 = vmatmul.mubr.bf16.gmra.mxu0 %v964_v34 }
 0x1e9   : > { %v880_v40 = vadd.f32 %v1832_v27, %v879_v42  ;;  %v946_v44 = vmax.f32 %v888_v37, 0.0 }
 0x1ea   : > { %v1507_v45 = vpop.f32.mrf.mxu1 }
 0x1eb   : > { %v944_v47 = vmax.f32 %v880_v40, 0.0  ;;  %v966_v51 = vpack.c.bf16 %v946_v44, %v945_v48  ;;  %v901_v56 = vadd.f32 %v1507_v45, %v1832_v27 }
 0x1ec   : > { %v892_v49 = vpop.f32.mrf.mxu1 }
 0x1ed   : > { %v965_v50 = vpack.c.bf16 %v944_v47, %v943_v46  ;;  %v893_v54 = vadd.f32 %v1832_v27, %v892_v49  ;;  %v949_v0 = vmax.f32 %v901_v56, 0.0 }
 0x1ee   : > { %v1508_v53 = vpop.f32.mrf.mxu1 }
 0x1ef   : > { %v904_v55 = vadd.f32 %v1508_v53, %v1832_v27  ;;  %1549 = vmatprep.mubr.bf16.mxu0 %v965_v50  ;;  %v947_v63 = vmax.f32 %v893_v54, 0.0 }
 0x1f0   : > { %v895_v58 = vpop.f32.mrf.mxu1  ;;  %1550 = vmatmul.mubr.bf16.gmra.mxu0 %v966_v51 }
 0x1f1   : > { %v896_v59 = vadd.f32 %v1832_v27, %v895_v58  ;;  %v950_v60 = vmax.f32 %v904_v55, 0.0 }
 0x1f2   : > { %v1511_v62 = vpop.f32.mrf.mxu1 }
 0x1f3   : > { %v948_v57 = vmax.f32 %v896_v59, 0.0  ;;  %v968_v43 = vpack.c.bf16 %v950_v60, %v949_v0  ;;  %v917_v5 = vadd.f32 %v1511_v62, %v1832_v27 }
 0x1f4   : > { %v908_v1 = vpop.f32.mrf.mxu1 }
 0x1f5   : > { %v967_v38 = vpack.c.bf16 %v948_v57, %v947_v63  ;;  %v909_v3 = vadd.f32 %v1832_v27, %v908_v1  ;;  %v953_v11 = vmax.f32 %v917_v5, 0.0 }
 0x1f6   : > { %v1512_v2 = vpop.f32.mrf.mxu1 }
 0x1f7   : > { %v920_v4 = vadd.f32 %v1512_v2, %v1832_v27  ;;  %1553 = vmatprep.mubr.bf16.mxu0 %v967_v38  ;;  %v951_v9 = vmax.f32 %v909_v3, 0.0 }
 0x1f8   : > { %v911_v6 = vpop.f32.mrf.mxu1  ;;  %1554 = vmatmul.mubr.bf16.gmra.mxu0 %v968_v43 }
 0x1f9   : > { %v912_v7 = vadd.f32 %v1832_v27, %v911_v6  ;;  %v954_v8 = vmax.f32 %v920_v4, 0.0 }
 0x1fb   : > { %v952_v10 = vmax.f32 %v912_v7, 0.0  ;;  %v970_v12 = vpack.c.bf16 %v954_v8, %v953_v11 }
 0x1fd   : > { %v969_v52 = vpack.c.bf16 %v952_v10, %v951_v9 }
 0x1ff   : > { %1557 = vmatprep.mubr.bf16.mxu0 %v969_v52 }
 0x200   : > { %1558 = vmatmul.mubr.bf16.gmra.mxu0 %v970_v12 }
 0x288   : > { %v1531_v27 = vpop.f32.mrf.mxu0 }
 0x289   : > { %v1085_v14 = vadd.f32 %v1531_v27, %v1870_v61 }
 0x28a   : > { %v1076_v15 = vpop.f32.mrf.mxu0 }
 0x28b   : > { %1205 = vst [vmem:[%s1875_s23 + $0x10] sm:$0xff] %v1085_v14  ;;  %v1077_v16 = vadd.f32 %v1870_v61, %v1076_v15 }
 0x28c   : > { %v1532_v17 = vpop.f32.mrf.mxu0 }
 0x28d   : > { %1203 = vst [vmem:[%s1875_s23] sm:$0xff] %v1077_v16  ;;  %v1088_v18 = vadd.f32 %v1532_v17, %v1870_v61 }
 0x28e   : > { %v1079_v19 = vpop.f32.mrf.mxu0 }
 0x28f   : > { %1206 = vst [vmem:[%s1875_s23 + $0x18] sm:$0xff] %v1088_v18  ;;  %v1080_v20 = vadd.f32 %v1870_v61, %v1079_v19 }
 0x290   : > { %v1535_v21 = vpop.f32.mrf.mxu0 }
 0x291   : > { %1204 = vst [vmem:[%s1875_s23 + $0x8] sm:$0xff] %v1080_v20  ;;  %v1101_v22 = vadd.f32 %v1535_v21, %v1870_v61 }
 0x292   : > { %v1092_v23 = vpop.f32.mrf.mxu0 }
 0x293   : > { %1209 = vst [vmem:[%s1875_s23 + $0x30] sm:$0xff] %v1101_v22  ;;  %v1093_v13 = vadd.f32 %v1870_v61, %v1092_v23 }
 0x294   : > { %v1536_v24 = vpop.f32.mrf.mxu0 }
 0x295   : > { %1207 = vst [vmem:[%s1875_s23 + $0x20] sm:$0xff] %v1093_v13  ;;  %v1104_v41 = vadd.f32 %v1536_v24, %v1870_v61 }
 0x296   : > { %v1095_v25 = vpop.f32.mrf.mxu0 }
 0x297   : > { %1210 = vst [vmem:[%s1875_s23 + $0x38] sm:$0xff] %v1104_v41  ;;  %v1096_v26 = vadd.f32 %v1870_v61, %v1095_v25 }
 0x298   : > { %v1539_v28 = vpop.f32.mrf.mxu0 }
 0x299   : > { %1208 = vst [vmem:[%s1875_s23 + $0x28] sm:$0xff] %v1096_v26  ;;  %v1117_v29 = vadd.f32 %v1539_v28, %v1870_v61 }
 0x29a   : > { %v1108_v30 = vpop.f32.mrf.mxu0 }
 0x29b   : > { %1213 = vst [vmem:[%s1875_s23 + $0x50] sm:$0xff] %v1117_v29  ;;  %v1109_v31 = vadd.f32 %v1870_v61, %v1108_v30 }
 0x29c   : > { %v1540_v32 = vpop.f32.mrf.mxu0 }
 0x29d   : > { %1211 = vst [vmem:[%s1875_s23 + $0x40] sm:$0xff] %v1109_v31  ;;  %v1120_v33 = vadd.f32 %v1540_v32, %v1870_v61 }
 0x29e   : > { %v1111_v34 = vpop.f32.mrf.mxu0 }
 0x29f   : > { %1214 = vst [vmem:[%s1875_s23 + $0x58] sm:$0xff] %v1120_v33  ;;  %v1112_v35 = vadd.f32 %v1870_v61, %v1111_v34 }
 0x2a0   : > { %v1543_v36 = vpop.f32.mrf.mxu0 }
 0x2a1   : > { %1212 = vst [vmem:[%s1875_s23 + $0x48] sm:$0xff] %v1112_v35  ;;  %v1133_v37 = vadd.f32 %v1543_v36, %v1870_v61 }
 0x2a2   : > { %v1124_v39 = vpop.f32.mrf.mxu0 }
 0x2a3   : > { %1217 = vst [vmem:[%s1875_s23 + $0x70] sm:$0xff] %v1133_v37  ;;  %v1125_v42 = vadd.f32 %v1870_v61, %v1124_v39 }
 0x2a4   : > { %v1544_v40 = vpop.f32.mrf.mxu0 }
 0x2a5   : > { %1215 = vst [vmem:[%s1875_s23 + $0x60] sm:$0xff] %v1125_v42  ;;  %v1136_v44 = vadd.f32 %v1544_v40, %v1870_v61 }
 0x2a6   : > { %v1127_v45 = vpop.f32.mrf.mxu0 }
 0x2a7   : > { %1218 = vst [vmem:[%s1875_s23 + $0x78] sm:$0xff] %v1136_v44  ;;  %v1128_v46 = vadd.f32 %v1870_v61, %v1127_v45 }
 0x2a8   : > { %v1547_v47 = vpop.f32.mrf.mxu0 }
 0x2a9   : > { %1216 = vst [vmem:[%s1875_s23 + $0x68] sm:$0xff] %v1128_v46  ;;  %v1149_v48 = vadd.f32 %v1547_v47, %v1870_v61 }
 0x2aa   : > { %v1140_v49 = vpop.f32.mrf.mxu0 }
 0x2ab   : > { %1221 = vst [vmem:[%s1875_s23 + $0x90] sm:$0xff] %v1149_v48  ;;  %v1141_v50 = vadd.f32 %v1870_v61, %v1140_v49 }
 0x2ac   : > { %v1548_v51 = vpop.f32.mrf.mxu0 }
 0x2ad   : > { %1219 = vst [vmem:[%s1875_s23 + $0x80] sm:$0xff] %v1141_v50  ;;  %v1152_v53 = vadd.f32 %v1548_v51, %v1870_v61 }
 0x2ae   : > { %v1143_v54 = vpop.f32.mrf.mxu0 }
 0x2af   : > { %1222 = vst [vmem:[%s1875_s23 + $0x98] sm:$0xff] %v1152_v53  ;;  %v1144_v55 = vadd.f32 %v1870_v61, %v1143_v54 }
 0x2b0   : > { %v1551_v56 = vpop.f32.mrf.mxu0 }
 0x2b1   : > { %1220 = vst [vmem:[%s1875_s23 + $0x88] sm:$0xff] %v1144_v55  ;;  %v1165_v58 = vadd.f32 %v1551_v56, %v1870_v61 }
 0x2b2   : > { %v1156_v59 = vpop.f32.mrf.mxu0 }
 0x2b3   : > { %1225 = vst [vmem:[%s1875_s23 + $0xb0] sm:$0xff] %v1165_v58  ;;  %v1157_v60 = vadd.f32 %v1870_v61, %v1156_v59 }
 0x2b4   : > { %v1552_v62 = vpop.f32.mrf.mxu0 }
 0x2b5   : > { %1223 = vst [vmem:[%s1875_s23 + $0xa0] sm:$0xff] %v1157_v60  ;;  %v1168_v63 = vadd.f32 %v1552_v62, %v1870_v61 }
 0x2b6   : > { %v1159_v57 = vpop.f32.mrf.mxu0 }
 0x2b7   : > { %1226 = vst [vmem:[%s1875_s23 + $0xb8] sm:$0xff] %v1168_v63  ;;  %v1160_v0 = vadd.f32 %v1870_v61, %v1159_v57 }
 0x2b8   : > { %v1555_v1 = vpop.f32.mrf.mxu0 }
 0x2b9   : > { %1224 = vst [vmem:[%s1875_s23 + $0xa8] sm:$0xff] %v1160_v0  ;;  %v1181_v38 = vadd.f32 %v1555_v1, %v1870_v61 }
 0x2ba   : > { %v1172_v43 = vpop.f32.mrf.mxu0 }
 0x2bb   : > { %1229 = vst [vmem:[%s1875_s23 + $0xd0] sm:$0xff] %v1181_v38  ;;  %v1173_v2 = vadd.f32 %v1870_v61, %v1172_v43 }
 0x2bc   : > { %v1556_v3 = vpop.f32.mrf.mxu0 }
 0x2bd   : > { %1227 = vst [vmem:[%s1875_s23 + $0xc0] sm:$0xff] %v1173_v2  ;;  %v1184_v4 = vadd.f32 %v1556_v3, %v1870_v61 }
 0x2be   : > { %v1175_v5 = vpop.f32.mrf.mxu0 }
 0x2bf   : > { %1230 = vst [vmem:[%s1875_s23 + $0xd8] sm:$0xff] %v1184_v4  ;;  %v1176_v6 = vadd.f32 %v1870_v61, %v1175_v5 }
 0x2c0   : > { %v1559_v7 = vpop.f32.mrf.mxu0 }
 0x2c1   : > { %1228 = vst [vmem:[%s1875_s23 + $0xc8] sm:$0xff] %v1176_v6  ;;  %v1197_v8 = vadd.f32 %v1559_v7, %v1870_v61 }
 0x2c2   : > { %v1188_v9 = vpop.f32.mrf.mxu0 }
 0x2c3   : > { %1233 = vst [vmem:[%s1875_s23 + $0xf0] sm:$0xff] %v1197_v8  ;;  %v1189_v10 = vadd.f32 %v1870_v61, %v1188_v9 }
 0x2c4   : > { %v1560_v11 = vpop.f32.mrf.mxu0 }
 0x2c5   : > { %1231 = vst [vmem:[%s1875_s23 + $0xe0] sm:$0xff] %v1189_v10  ;;  %v1200_v52 = vadd.f32 %v1560_v11, %v1870_v61 }
 0x2c6   : > { %v1191_v12 = vpop.f32.mrf.mxu0 }
 0x2c7   : > { %1234 = vst [vmem:[%s1875_s23 + $0xf8] sm:$0xff] %v1200_v52  ;;  %v1192_v27 = vadd.f32 %v1870_v61, %v1191_v12 }
 0x2c9   : > { %1232 = vst [vmem:[%s1875_s23 + $0xe8] sm:$0xff] %v1192_v27 }
 0x2ca PF: > { %s17_s24 = sadd.s32 1, %s1631_s24  }
 0x2cb   : > { %p14_p4 = scmp.ge.s32.totalorder %s17_s24, 4  }
 0x2cd   :  { %16 = sbr.rel (!%p14_p4) target bundleno = 1 (0x1), region = 78 }

</bundles_post_ra>
